<compile_context>
chip_gen: v7x
topology: tpu7x:2x2x1
jax: 0.10.0
libtpu: 0.0.40
codegen_flags: <defaults>
</compile_context>

<pallas_src>
import math

import jax
import jax.numpy as jnp
from jax.experimental import pallas as pl
from jax.experimental.pallas import tpu as pltpu

_LANES = 128
_SUBLANES = 8


def _rff_kernel(x_ref, wp_ref, out_ref):
    # x_ref:   [TB, 1] (broadcast layout) or [TB, C] (packed layout)
    # wp_ref:  [2, C]  row 0 = weights (2*pi folded, duplicated), row 1 = phase
    # out_ref: [TB, C] lane-dense output tile (C is a multiple of 128)
    t = x_ref[...] * wp_ref[0:1, :] + wp_ref[1:2, :]
    out_ref[...] = jnp.sin(t).astype(out_ref.dtype)


def _round_up(n, m):
    return ((n + m - 1) // m) * m


def _round_down(n, m):
    return (n // m) * m


def _pick_tile_rows(rows, lane_width, *, max_rows=1024,
                    vmem_budget=12 * 1024 * 1024):
    """Row tile that (a) fits a double-buffered VMEM budget, (b) is a multiple
    of 8 (or covers all rows), (c) leaves >= 2 grid steps when rows allow it so
    the 'parallel' axis can shard across v7x's two TensorCores."""
    if rows <= _SUBLANES:
        return rows  # single full block (block == full array dim)
    # double-buffered bytes per row: output tile + x tile (x lane-pads to 128)
    per_row = 2 * 4 * (lane_width + _LANES)
    budget_rows = max(_SUBLANES, _round_down(vmem_budget // per_row, _SUBLANES))
    tb = min(max_rows, budget_rows)
    # v7x: ensure the grid has >= 2 steps so both TensorCores get work.
    half = max(_SUBLANES, _round_down(pl.cdiv(rows, 2), _SUBLANES))
    tb = min(tb, half)
    return min(tb, _round_up(rows, _SUBLANES))


def _rff_pallas(x2, wp, rows, lane_width, out_dtype):
    """x2: [rows, 1] or [rows, lane_width]; wp: [2, lane_width]."""
    tb = _pick_tile_rows(rows, lane_width)
    grid = (pl.cdiv(rows, tb),)
    x_cols = x2.shape[1]

    cost = pl.CostEstimate(
        flops=25 * rows * lane_width,          # sin ~= 20-30 VALU ops / element
        transcendentals=rows * lane_width,
        bytes_accessed=(rows * lane_width * jnp.dtype(out_dtype).itemsize
                        + int(x2.size) * 4 + int(wp.size) * 4),
    )

    return pl.pallas_call(
        _rff_kernel,
        out_shape=jax.ShapeDtypeStruct((rows, lane_width), out_dtype),
        grid=grid,
        in_specs=[
            pl.BlockSpec((tb, x_cols), lambda i: (i, 0)),        # x tile
            pl.BlockSpec((2, lane_width), lambda i: (0, 0)),     # weights+phase (resident)
        ],
        out_specs=pl.BlockSpec((tb, lane_width), lambda i: (i, 0)),
        compiler_params=pltpu.CompilerParams(
            dimension_semantics=("parallel",)),
        cost_estimate=cost,
    )(x2, wp)


def gaussian_random_fourier_features(x, rff_weights, *, out_dtype=None,
                                     min_pallas_elems=100_000):
    """x: [B] float, rff_weights: [embed_dim//2] float -> [B, embed_dim]."""
    B = int(x.shape[0])
    half = int(rff_weights.shape[0])
    E = 2 * half
    out_dtype = jnp.float32 if out_dtype is None else out_dtype

    x1 = x.reshape(B).astype(jnp.float32)
    w = rff_weights.astype(jnp.float32)

    # Fold 2*pi into the fixed weights; cos half becomes sin with a +pi/2 phase.
    w_cat = jnp.concatenate([w, w]) * (2.0 * math.pi)                        # [E]
    phase = jnp.concatenate([jnp.zeros((half,), jnp.float32),
                             jnp.full((half,), 0.5 * math.pi, jnp.float32)])  # [E]

    # Tiny problems: custom-call boundary + grid-step overhead dominates.
    if B * E < min_pallas_elems:
        out = jnp.sin(x1[:, None] * w_cat[None, :] + phase[None, :])
        return out.astype(out_dtype)

    if E % _LANES == 0:
        # Already lane-dense: [B, E] with E a multiple of 128.
        wp = jnp.stack([w_cat, phase])                                       # [2, E]
        return _rff_pallas(x1[:, None], wp, B, E, out_dtype)

    if _LANES % E == 0:
        # Pack R = 128/E batch rows per 128-lane output row. The packed output
        # is exactly the row-major flat reshape of [B, E]: 100% useful lanes,
        # unmasked stores, no extra output copy.
        R = _LANES // E
        b_pad = _round_up(B, R)
        rows = b_pad // R
        xp = jnp.pad(x1, (0, b_pad - B)).reshape(rows, R)
        xp = jnp.repeat(xp, E, axis=1)                                       # [rows, 128]
        wp = jnp.stack([jnp.tile(w_cat, R), jnp.tile(phase, R)])             # [2, 128]
        out = _rff_pallas(xp, wp, rows, _LANES, out_dtype)                   # [rows, 128]
        out = out.reshape(b_pad, E)
        return out if b_pad == B else out[:B]

    # Awkward E (neither a multiple nor a divisor of 128): pad the feature axis
    # with zero-weight columns so stores stay unmasked; slice afterwards.
    e_pad = _round_up(E, _LANES)
    wp = jnp.stack([jnp.pad(w_cat, (0, e_pad - E)),
                    jnp.pad(phase, (0, e_pad - E))])                         # [2, e_pad]
    out = _rff_pallas(x1[:, None], wp, B, e_pad, out_dtype)
    return out[:, :E]


if __name__ == "__main__":
    key = jax.random.PRNGKey(0)
    k_w, k_x, k_w2, k_x2 = jax.random.split(key, 4)

    def reference(xv, wv):
        proj = xv[:, None] * wv[None, :] * 2.0 * math.pi
        return jnp.concatenate([jnp.sin(proj), jnp.cos(proj)], axis=-1)

    scale = 30.0
    ok = True

    # Config 1: the module's natural small shape (embed_dim=32, batch=8).
    # E=32 < 128 exercises the packed lane-dense path. Force the Pallas path
    # (the default dispatcher would use the tiny-problem jnp fallback here).
    embed_dim, batch = 32, 8
    rw = jax.random.normal(k_w, (embed_dim // 2,), jnp.float32) * scale
    x = jax.random.uniform(k_x, (batch,), jnp.float32)
    out = jax.block_until_ready(
        gaussian_random_fourier_features(x, rw, min_pallas_elems=0))
    ref = reference(x, rw)
    ok &= out.shape == (batch, embed_dim)
    ok &= bool(jnp.allclose(out, ref, atol=5e-4, rtol=1e-5))

    # Config 2: E a multiple of 128 exercises the broadcast lane-dense path
    # (and a multi-step grid).
    embed_dim2, batch2 = 256, 16
    rw2 = jax.random.normal(k_w2, (embed_dim2 // 2,), jnp.float32) * scale
    x2 = jax.random.uniform(k_x2, (batch2,), jnp.float32)
    out2 = jax.block_until_ready(
        gaussian_random_fourier_features(x2, rw2, min_pallas_elems=0))
    ref2 = reference(x2, rw2)
    ok &= out2.shape == (batch2, embed_dim2)
    ok &= bool(jnp.allclose(out2, ref2, atol=5e-4, rtol=1e-5))

    assert ok, "mismatch vs reference"
    print("KERNEL_OK")
</pallas_src>

<mosaic_0001>
module attributes {stable_mosaic.version = 11 : i64} {
  func.func @_rff_kernel(%arg0: i32, %arg1: memref<2x128xf32, #tpu.memory_space<vmem>>, %arg2: memref<2x128xf32, #tpu.memory_space<vmem>>, %arg3: memref<2x128xf32, #tpu.memory_space<vmem>>) attributes {dimension_semantics = [#tpu.dimension_semantics<parallel>], iteration_bounds = array<i64: 1>, scalar_prefetch = 0 : i64, scratch_operands = 0 : i64, tpu.core_type = #tpu.core_type<tc>, window_params = [{transform_indices = @transform_0, window_bounds = array<i64: 2, 128>}, {pipeline_mode = #tpu.pipeline_mode<synchronous>, transform_indices = @transform_1, window_bounds = array<i64: 2, 128>}, {transform_indices = @transform_2, window_bounds = array<i64: 2, 128>}]} {
    %c0 = arith.constant 0 : index
    %c0_0 = arith.constant 0 : index
    %0 = vector.load %arg1[%c0, %c0_0] : memref<2x128xf32, #tpu.memory_space<vmem>>, vector<2x128xf32>
    %c0_1 = arith.constant 0 : index
    %c0_2 = arith.constant 0 : index
    %1 = vector.load %arg2[%c0_1, %c0_2] : memref<2x128xf32, #tpu.memory_space<vmem>>, vector<1x128xf32>
    %2 = vector.broadcast %1 : vector<1x128xf32> to vector<2x128xf32>
    %3 = arith.mulf %0, %2 : vector<2x128xf32>
    %c1 = arith.constant 1 : index
    %c0_3 = arith.constant 0 : index
    %4 = vector.load %arg2[%c1, %c0_3] : memref<2x128xf32, #tpu.memory_space<vmem>>, vector<1x128xf32>
    %5 = vector.broadcast %4 : vector<1x128xf32> to vector<2x128xf32>
    %6 = arith.addf %3, %5 : vector<2x128xf32>
    %7 = math.sin %6 : vector<2x128xf32>
    %c0_4 = arith.constant 0 : index
    %c0_5 = arith.constant 0 : index
    %8 = vector.load %arg3[%c0_4, %c0_5] : memref<2x128xf32, #tpu.memory_space<vmem>>, vector<2x128xf32>
    tpu.vector_store %arg3[%c0_4, %c0_5], %7 {strides = array<i32>} : memref<2x128xf32, #tpu.memory_space<vmem>>, vector<2x128xf32>,
    return
  }
  func.func @transform_0(%arg0: i32) -> (i32, i32) {
    %c0_i32 = arith.constant 0 : i32
    %c0_i32_0 = arith.constant 0 : i32
    return %arg0, %c0_i32 : i32, i32
  }
  func.func @transform_1(%arg0: i32) -> (i32, i32) {
    %c0_i32 = arith.constant 0 : i32
    %c0_i32_0 = arith.constant 0 : i32
    %c0_i32_1 = arith.constant 0 : i32
    return %c0_i32, %c0_i32_0 : i32, i32
  }
  func.func @transform_2(%arg0: i32) -> (i32, i32) {
    %c0_i32 = arith.constant 0 : i32
    %c0_i32_0 = arith.constant 0 : i32
    return %arg0, %c0_i32 : i32, i32
  }
}

</mosaic_0001>

<bundles_post_ra>
// kernel: tpu_custom_call.1
= control target key start
LH: loop header
LB: loop body
LE: loop exit
PB: predicated region body
PF: predicated region fallthrough
CT: control target
= control target key end

     0   :  { %7 = vsyncpa [#allocation3], 0  ;;  %s301_s0 = inlined_call_operand.hbm [shape: f32[2,128], index: 0, kind: input, shape index: {}]   ;;  %s302_s1 = inlined_call_operand.vmem [shape: f32[2,128], index: 1, kind: input, shape index: {}]   ;;  %s303_s2 = inlined_call_operand.hbm [shape: f32[2,128], index: 2, kind: output, shape index: {}]  }
   0x1   :  { %8 = vsyncpa [#allocation4], 0  ;;  %s227_s9 = smov [#allocation2]   ;;  %s179_s13 = scalar_lea.hbm %s301_s0, 32 }
   0x2   :  { %s15_s10 = sshll.u32 %s227_s9, 4  ;;  %p180_p0 = scmp.ne.s32.totalorder %s301_s0, %s179_s13  ;;  %s16_s10 = int_to_ptr.vmem [resolvable:$true] %s15_s10 }
   0x3   :  { %p183_p1 = scmp.lt.u32.totalorder %s179_s13, %s301_s0 }
   0x5   :  { %p185_p2 = pnand %p183_p1, %p180_p0 }
   0x7   :  { %188 = shalt.err (!%p185_p2)
}
   0x8   :  { %s189_s18 = scalar_lea.vmem %s16_s10, 32  ;;  %p194_p4 = scmp.lt.s32.totalorder %s16_s10, %s16_s10 }
   0x9   :  { %p190_p3 = scmp.ne.s32.totalorder %s16_s10, %s189_s18  ;;  %p195_p5 = scmp.lt.s32.totalorder %s189_s18, %s189_s18 }
   0xb   :  { %p196_p6 = por %p195_p5, %p194_p4 }
   0xd   :  { %p197_p7 = pnand %p196_p6, %p190_p3 }
   0xf   :  { %200 = shalt.err (!%p197_p7)
}
  0x10   :  { %18 = dma.hbm_to_vmem [thread:$0]  %s301_s0, 32, %s16_s10, [#allocation3]  }
  0x11   :  { %223 = dma.done.wait [#allocation3], 32  }
  0x12   :  { %224 = vsyncadd [#allocation3], 4294967264  ;;  %v24_v0 = vld [vmem:[#allocation2] sm:$0x3]  ;;  %v228_v16 = vmov 683565275  }
  0x13   :  { %v157_v1 = vld [vmem:[%s302_s1] ss:$0 sm:$0xff]  ;;  %v158_v2 = vld [vmem:[%s302_s1 + $0x1] ss:$0 sm:$0xff]  ;;  %v229_v18 = vmov 2475754826  }
  0x14   :  { %v30_v3 = vmul.f32 %v157_v1, %v24_v0  ;;  %v230_v20 = vmov 2131351028   ;;  %v231_v22 = vmov 2102212464   ;;  %v232_v24 = vmov 920167782  }
  0x15   :  { %v233_v31 = vmov 1326507024   ;;  %s234_s0 = smov [#allocation5]  }
  0x16   :  { %v268_v4 = vadd.f32 %v158_v2, %v30_v3  ;;  %s148_s1 = sshll.u32 %s234_s0, 4  ;;  %s149_s1 = int_to_ptr.vmem [resolvable:$true] %s148_s1 }
  0x17   :  { %s201_s25 = scalar_lea.vmem %s149_s1, 32  ;;  %p206_p9 = scmp.lt.s32.totalorder %s149_s1, %s149_s1 }
  0x18   :  { %v40_v5 = vand.u32 2139095040, %v268_v4  ;;  %v37_v7 = vand.u32 2147483647, %v268_v4  ;;  %vm39_vm7 = vcmp.lt.s32.totalorder %v268_v4, 0  ;;  %vm129_vm12 = vweird.f32 %v268_v4  ;;  %p202_p8 = scmp.ne.s32.totalorder %s149_s1, %s201_s25  ;;  %p207_p10 = scmp.lt.s32.totalorder %s201_s25, %s201_s25 }
  0x1a   :  { %v41_v6 = vshrl.u32 %v40_v5, 23  ;;  %v44_v10 = vand.u32 8388607, %v37_v7  ;;  %vm38_vm8 = vcmp.le.f32.partialorder %v37_v7, 0.7853982  ;;  %p208_p11 = por %p207_p10, %p206_p9 }
  0x1c   :  { %v159_v8 = vadd.s32 4294967169, %v41_v6  ;;  %v45_v13 = vor.u32 8388608, %v44_v10  ;;  %p209_p12 = pnand %p208_p11, %p202_p8 }
  0x1e   :  { %v47_v9 = vadd.s32 1, %v159_v8  ;;  %v85_v33 = vshll.u32 %v45_v13, 8 }
  0x20   :  { %vm48_vm0 = vcmp.gt.s32.totalorder %v47_v9, 0 }
  0x21   :  { %v49_v11 = vsel %vm48_vm0, %v47_v9, 0 }
  0x22   :  { %v51_v12 = vand.u32 31, %v49_v11  ;;  %v50_v14 = vshrl.u32 %v49_v11, 5 }
  0x24   :  { %v52_v15 = vsub.s32 32, %v51_v12  ;;  %v54_v17 = vshll.u32 %v228_v16, %v51_v12  ;;  %v57_v19 = vshll.u32 %v229_v18, %v51_v12  ;;  %v60_v21 = vshll.u32 %v230_v20, %v51_v12 }
  0x25   :  { %v63_v23 = vshll.u32 %v231_v22, %v51_v12  ;;  %v66_v25 = vshll.u32 %v232_v24, %v51_v12  ;;  %vm69_vm1 = vcmp.lt.s32.totalorder %v50_v14, 1  ;;  %vm72_vm2 = vcmp.lt.s32.totalorder %v50_v14, 4 }
  0x26   :  { %v53_v26 = vshrl.u32 %v228_v16, %v52_v15  ;;  %v55_v27 = vshrl.u32 %v229_v18, %v52_v15  ;;  %v58_v28 = vshrl.u32 %v230_v20, %v52_v15  ;;  %v61_v29 = vshrl.u32 %v231_v22, %v52_v15 }
  0x27   :  { %v64_v30 = vshrl.u32 %v232_v24, %v52_v15  ;;  %v67_v32 = vshrl.u32 %v233_v31, %v52_v15  ;;  %vm70_vm3 = vcmp.lt.s32.totalorder %v50_v14, 2  ;;  %vm71_vm4 = vcmp.lt.s32.totalorder %v50_v14, 3 }
  0x28   :  { %v56_v34 = vor.u32 %v55_v27, %v54_v17  ;;  %v59_v35 = vor.u32 %v58_v28, %v57_v19  ;;  %v62_v36 = vor.u32 %v61_v29, %v60_v21 }
  0x29   :  { %v65_v37 = vor.u32 %v64_v30, %v63_v23  ;;  %v68_v38 = vor.u32 %v67_v32, %v66_v25 }
  0x2a   :  { %v73_v39 = vsel %vm69_vm1, %v53_v26, %v56_v34  ;;  %v74_v40 = vsel %vm72_vm2, %v62_v36, 2102212464  ;;  %v77_v41 = vsel %vm69_vm1, %v56_v34, %v59_v35  ;;  %v81_v42 = vsel %vm69_vm1, %v59_v35, %v62_v36 }
  0x2b   :  { %v75_v43 = vsel %vm71_vm4, %v59_v35, %v74_v40  ;;  %v78_v44 = vsel %vm72_vm2, %v65_v37, 920167782  ;;  %v82_v45 = vsel %vm72_vm2, %v68_v38, 1326507024 }
  0x2c   :  { %v79_v46 = vsel %vm71_vm4, %v62_v36, %v78_v44  ;;  %v83_v47 = vsel %vm71_vm4, %v65_v37, %v82_v45  ;;  %v76_v48 = vsel %vm70_vm3, %v73_v39, %v75_v43 }
  0x2d   :  { %v80_v49 = vsel %vm70_vm3, %v77_v41, %v79_v46  ;;  %v84_v50 = vsel %vm70_vm3, %v81_v42, %v83_v47  ;;  %v92_v55 = vmul.u32 %v85_v33, %v76_v48 }
  0x2e   :  { %v274_v51 = vmul.u32.u64.low %v85_v33, %v84_v50  ;;  %v275_v52 = vmul.u32.u64.high %v85_v33, %v84_v50, %v274_v51  ;;  %v277_v53 = vmul.u32.u64.low %v85_v33, %v80_v49  ;;  %v278_v54 = vmul.u32.u64.high %v85_v33, %v80_v49, %v277_v53 }
  0x30   :  { %vm94_vm5 = vc.u32 %v275_v52, %v277_v53  ;;  %v95_v56 = vadd.s32 1, %v278_v54  ;;  %v93_v3 = vadd.s32 %v277_v53, %v275_v52 }
  0x32   :  { %v96_v57 = vsel %vm94_vm5, %v95_v56, %v278_v54 }
  0x33   :  { %v97_v58 = vadd.s32 %v96_v57, %v92_v55 }
  0x35   :  { %v98_v59 = vadd.s32 536870912, %v97_v58 }
  0x37   :  { %v99_v60 = vshrl.u32 %v98_v59, 30 }
  0x39   :  { %v100_v61 = vshll.u32 %v99_v60, 30  ;;  %v123_v17 = vsub.s32 4, %v99_v60 }
  0x3b   :  { %v101_v62 = vsub.s32 %v97_v58, %v100_v61  ;;  %v124_v20 = vsel %vm39_vm7, %v123_v17, %v99_v60 }
  0x3c   :  { %v126_v23 = vsel %vm38_vm8, 0, %v124_v20 }
  0x3d   :  { %v103_v63 = vsub.s32 0, %v101_v62  ;;  %v130_v24 = vadd.s32 3, %v126_v23 }
  0x3f   :  { %v160_v0 = vmin.u32 %v103_v63, %v101_v62  ;;  %v131_v25 = vand.u32 3, %v130_v24 }
  0x41   :  { %v105_v1 = vclz %v160_v0  ;;  %vm136_vm9 = vcmp.eq.s32.totalorder %v131_v25, 2  ;;  %vm133_vm10 = vcmp.eq.s32.totalorder %v131_v25, 0  ;;  %vm132_vm11 = vcmp.lt.s32.totalorder %v131_v25, 2 }
  0x43   :  { %v161_v2 = vadd.s32 4294967294, %v105_v1 }
  0x45   :  { %vm162_vm6 = vcmp.lt.s32.totalorder %v161_v2, 0 }
  0x46   :  { %v108_v5 = vsel %vm162_vm6, 0, %v161_v2 }
  0x47   :  { %v109_v6 = vsub.s32 32, %v108_v5  ;;  %v110_v8 = vshll.u32 %v101_v62, %v108_v5  ;;  %v113_v9 = vsub.s32 4294967266, %v108_v5 }
  0x49   :  { %v111_v10 = vshrl.u32 %v93_v3, %v109_v6  ;;  %v114_v11 = vadd.s32 127, %v113_v9 }
  0x4b   :  { %v112_v12 = vor.u32 %v111_v10, %v110_v8  ;;  %v115_v13 = vshll.u32 %v114_v11, 23 }
  0x4d   :  { %v116_v14 = vor.u32 4788187, %v115_v13  ;;  %v119_v15 = vcvt.s32.f32 %v112_v12 }
  0x4f   :  { %v117_v16 = vand.u32 2147483647, %v116_v14 }
  0x51   :  { %v120_v18 = vmul.f32 %v119_v15, %v117_v16 }
  0x53   :  { %v121_v19 = vxor.u32 2147483648, %v120_v18 }
  0x55   :  { %v122_v21 = vsel %vm39_vm7, %v121_v19, %v120_v18 }
  0x56   :  { %v125_v22 = vsel %vm38_vm8, %v268_v4, %v122_v21 }
  0x57   :  { %175 = vcosq.f32 %v125_v22 }
  0x58   :  { %177 = vsinq.f32 %v125_v22 }
  0x61   :  { %v176_v26 = vpop.eup %175 }
  0x62   :  { %v178_v27 = vpop.eup %177  ;;  %v137_v28 = vxor.u32 2147483648, %v176_v26 }
  0x63   :  { %v134_v29 = vxor.u32 2147483648, %v178_v27 }
  0x64   :  { %v138_v7 = vsel %vm136_vm9, %v137_v28, %v178_v27 }
  0x65   :  { %v135_v30 = vsel %vm133_vm10, %v176_v26, %v134_v29 }
  0x66   :  { %v139_v31 = vsel %vm132_vm11, %v135_v30, %v138_v7 }
  0x67   :  { %v140_v32 = vsel %vm129_vm12, nan, %v139_v31 }
  0x68   :  { %141 = vst [vmem:[#allocation5] sm:$0x3] %v140_v32 }
  0x69   :  { %212 = shalt.err (!%p209_p12)
}
  0x6a   :  { %s213_s28 = scalar_lea.hbm %s303_s2, 32 }
  0x6b   :  { %p214_p13 = scmp.ne.s32.totalorder %s303_s2, %s213_s28  ;;  %p217_p0 = scmp.lt.u32.totalorder %s213_s28, %s303_s2 }
  0x6d   :  { %p219_p1 = pnand %p217_p0, %p214_p13 }
  0x6f   :  { %222 = shalt.err (!%p219_p1)
}
  0x70   :  { %151 = dma.vmem_to_hbm [thread:$0]  %s149_s1, 32, %s303_s2, [#allocation4]  }
  0x71   :  { %225 = dma.done.wait [#allocation4], 32  }
  0x72   :  { %226 = vsyncadd [#allocation4], 4294967264 }
  0x73   :  { %155 = vsyncpa [#allocation3], 1 }
  0x74   :  { %156 = vsyncpa [#allocation4], 1 }

</bundles_post_ra>
